<compile_context>
chip_gen: v5e
topology: v5e:2x2
jax: 0.10.0
libtpu: 0.0.40
codegen_flags: <defaults>
</compile_context>

<pallas_src>
import functools

import jax
import jax.numpy as jnp
from jax.experimental import pallas as pl
from jax.experimental.pallas import tpu as pltpu


def _round_up(x, m):
    return ((x + m - 1) // m) * m


def _cdiv(a, b):
    return -(-a // b)


def _vmem_limit_bytes():
    """Per-generation scoped-VMEM limit: ~48 MiB on v7x, 96 MiB on v5e/v6e."""
    try:
        cap = int(pltpu.get_tpu_info().vmem_capacity_bytes)
    except Exception:
        cap = 64 * 1024 * 1024  # conservative fallback (v7x physical VMEM)
    return int(min(cap * 3 // 4, 96 * 1024 * 1024))


# ---------------------------------------------------------------------------
# Pass 1: per-shard partial spatial sums (global average pool numerator).
# grid = (n_shards, tiles_per_shard) -> ("parallel", "arbitrary").
# The partial last tile (and any shard-padding tile) is iota-masked.
# ---------------------------------------------------------------------------
def _partial_sum_kernel(x_ref, psum_ref, *, s_total, tile_s, tiles_per_shard,
                        need_mask):
    # x_ref:    (B, C, tS) spatial tile
    # psum_ref: (1, B, C)  per-shard running sum (output block, revisited on k)
    p = pl.program_id(0)   # shard ("parallel")
    k = pl.program_id(1)   # spatial tile within shard ("arbitrary")

    @pl.when(k == 0)
    def _():
        psum_ref[...] = jnp.zeros_like(psum_ref)

    if not need_mask:
        psum_ref[...] += jnp.sum(x_ref[...], axis=-1)[None]
    else:
        # Number of valid lanes in this (possibly partial / shard-padding) tile.
        rem = s_total - (p * tiles_per_shard + k) * tile_s

        @pl.when(rem >= tile_s)            # full tile: no masking work
        def _():
            psum_ref[...] += jnp.sum(x_ref[...], axis=-1)[None]

        @pl.when(rem < tile_s)             # partial (or fully out-of-range) tile
        def _():
            lane = jax.lax.broadcasted_iota(jnp.int32, x_ref.shape, 2)
            xm = jnp.where(lane < rem, x_ref[...], 0.0)
            psum_ref[...] += jnp.sum(xm, axis=-1)[None]


# ---------------------------------------------------------------------------
# Pass 2: apply channel gates, compute & apply spatial (1x1x1 conv) gates,
# take the elementwise max.  grid = (n_tiles,), fully "parallel".
# ---------------------------------------------------------------------------
def _scse_apply_kernel(x_ref, cgate_ref, sw_ref, sb_ref, o_ref):
    # x_ref:     (B, C, tS)
    # cgate_ref: (B, C, 1)   channel gates
    # sw_ref:    (1, C, 1)   conv weight, sb_ref: (1, 1, 1) conv bias
    x = x_ref[...]
    s_logit = jnp.sum(x * sw_ref[...], axis=1, keepdims=True) + sb_ref[...]
    s_gate = jax.nn.sigmoid(s_logit)                                  # (B, 1, tS)
    o_ref[...] = jnp.maximum(x * cgate_ref[...], x * s_gate).astype(o_ref.dtype)


def channel_spatial_se_3d(x, w1, b1, w2, b2, sw, sb, *, tile_s=None,
                          max_block_bytes=8 * 1024 * 1024):
    """x: (B, C, D, H, W) f32.  Returns (B, C, D, H, W).

    w1: (C, Cr), b1: (Cr,)  -- cSE fc1 (already x@W layout)
    w2: (Cr, C), b2: (C,)   -- cSE fc2
    sw: (C,),    sb: ()     -- sSE 1x1x1 conv weight / bias
    """
    B, C, D, H, W = x.shape
    Cr = w1.shape[1]
    S = D * H * W
    x3 = x.reshape(B, C, S)            # free reshape (contiguous), no copy

    vmem_limit = _vmem_limit_bytes()

    # Lane-dense spatial tile, sized from the VMEM budget: pass 2 holds
    # (x in + out) * 2 double-buffers of B*C*tS*4 bytes.
    if tile_s is None:
        row_bytes = B * C * 4                       # f32 bytes per lane column
        budget = min(vmem_limit // 6, max_block_bytes)
        tile_s = max(128, (budget // row_bytes) // 128 * 128)
    tS = max(128, (tile_s // 128) * 128)
    tS = min(tS, _round_up(S, 128))
    n_tiles = _cdiv(S, tS)

    # Split the streaming reduction across 2 "parallel" shards so both
    # TensorCores are used on v7x (harmless serial loop on v5e/v6e).
    n_shards = 2 if n_tiles >= 2 else 1
    tiles_per_shard = _cdiv(n_tiles, n_shards)
    need_mask = (S % tS != 0) or (n_shards * tiles_per_shard != n_tiles)

    # ---- Pass 1: per-shard partial sums over the spatial axis -------------
    partials = pl.pallas_call(
        functools.partial(_partial_sum_kernel, s_total=S, tile_s=tS,
                          tiles_per_shard=tiles_per_shard, need_mask=need_mask),
        out_shape=jax.ShapeDtypeStruct((n_shards, B, C), jnp.float32),
        grid=(n_shards, tiles_per_shard),
        in_specs=[pl.BlockSpec(
            (B, C, tS),
            # Clamp shard-padding steps to the last in-bounds tile; the
            # in-kernel mask zeroes their contribution.
            lambda p, k: (0, 0, jnp.minimum(p * tiles_per_shard + k,
                                            n_tiles - 1)))],
        out_specs=pl.BlockSpec((1, B, C), lambda p, k: (p, 0, 0)),
        compiler_params=pltpu.CompilerParams(
            dimension_semantics=("parallel", "arbitrary"),
            vmem_limit_bytes=vmem_limit),
        cost_estimate=pl.CostEstimate(
            flops=B * C * S, transcendentals=0,
            bytes_accessed=B * C * S * 4),
    )(x3)

    # ---- Tiny (B,C)-sized excitation MLP, hoisted out of the kernel -------
    mean = partials.sum(axis=0) * (1.0 / S)                          # (B, C)
    h = jax.nn.relu(mean @ w1 + b1)
    cgate = jax.nn.sigmoid(h @ w2 + b2)                              # (B, C)

    # ---- Pass 2: spatial gate + channel gate + elementwise max ------------
    out3 = pl.pallas_call(
        _scse_apply_kernel,
        out_shape=jax.ShapeDtypeStruct((B, C, S), x.dtype),
        grid=(n_tiles,),
        in_specs=[
            pl.BlockSpec((B, C, tS), lambda k: (0, 0, k)),   # x tile
            pl.BlockSpec((B, C, 1), lambda k: (0, 0, 0)),    # channel gates
            pl.BlockSpec((1, C, 1), lambda k: (0, 0, 0)),    # conv weight
            pl.BlockSpec((1, 1, 1), lambda k: (0, 0, 0)),    # conv bias
        ],
        out_specs=pl.BlockSpec((B, C, tS), lambda k: (0, 0, k)),
        compiler_params=pltpu.CompilerParams(
            dimension_semantics=("parallel",),
            vmem_limit_bytes=vmem_limit),
        cost_estimate=pl.CostEstimate(
            flops=6 * B * C * S, transcendentals=B * S,
            bytes_accessed=2 * B * C * S * 4),
    )(x3, cgate.reshape(B, C, 1), sw.reshape(1, C, 1), sb.reshape(1, 1, 1))

    return out3.reshape(B, C, D, H, W)


# ---------------------------------------------------------------------------
# Pure-JAX reference (mirrors the PyTorch module's forward)
# ---------------------------------------------------------------------------
def _reference(x, w1, b1, w2, b2, sw, sb):
    mean = jnp.mean(x, axis=(2, 3, 4))                            # (B, C)
    h = jax.nn.relu(mean @ w1 + b1)
    cgate = jax.nn.sigmoid(h @ w2 + b2)                           # (B, C)
    cse = x * cgate[:, :, None, None, None]
    slogit = jnp.einsum('bcdhw,c->bdhw', x, sw) + sb
    sse = x * jax.nn.sigmoid(slogit)[:, None]
    return jnp.maximum(cse, sse)


if __name__ == "__main__":
    B, C, REDUCTION = 2, 8, 2
    Cr = C // REDUCTION

    key = jax.random.PRNGKey(0)
    kx, k1, kb1, k2, kb2, ksw, ksb, kx2 = jax.random.split(key, 8)

    # PyTorch-Linear-style uniform init (fan-in scaled).
    lim1 = 1.0 / (C ** 0.5)
    lim2 = 1.0 / (Cr ** 0.5)
    w1 = jax.random.uniform(k1, (C, Cr), jnp.float32, -lim1, lim1)
    b1 = jax.random.uniform(kb1, (Cr,), jnp.float32, -lim1, lim1)
    w2 = jax.random.uniform(k2, (Cr, C), jnp.float32, -lim2, lim2)
    b2 = jax.random.uniform(kb2, (C,), jnp.float32, -lim2, lim2)
    sw = jax.random.uniform(ksw, (C,), jnp.float32, -lim1, lim1)   # Conv3d(C,1,1) weight
    sb = jax.random.uniform(ksb, (), jnp.float32, -lim1, lim1)     # Conv3d bias

    # Case 1: spatial volume divisible by the tile; forced small tiles
    # exercise the 2-shard streaming reduction.
    x = jax.random.normal(kx, (B, C, 8, 8, 8), dtype=jnp.float32)
    ref = _reference(x, w1, b1, w2, b2, sw, sb)
    out = jax.block_until_ready(
        channel_spatial_se_3d(x, w1, b1, w2, b2, sw, sb, tile_s=128))
    assert out.shape == x.shape
    assert jnp.allclose(out, ref, atol=2e-5, rtol=2e-5), "mismatch (case 1, small tiles)"

    # Same input with the auto (VMEM-budget) tile size -> single big tile.
    out_big = jax.block_until_ready(
        channel_spatial_se_3d(x, w1, b1, w2, b2, sw, sb))
    assert jnp.allclose(out_big, ref, atol=2e-5, rtol=2e-5), "mismatch (case 1, auto tile)"

    # Case 2: spatial volume NOT divisible by the tile — exercises the masked
    # partial tile and the clamped shard-padding step (no pad/slice copies).
    x2 = jax.random.normal(kx2, (B, C, 5, 8, 8), dtype=jnp.float32)
    ref2 = _reference(x2, w1, b1, w2, b2, sw, sb)
    out2 = jax.block_until_ready(
        channel_spatial_se_3d(x2, w1, b1, w2, b2, sw, sb, tile_s=128))
    assert out2.shape == x2.shape
    assert jnp.allclose(out2, ref2, atol=2e-5, rtol=2e-5), "mismatch (case 2)"

    print("KERNEL_OK")
</pallas_src>

<mosaic_0001>
module attributes {stable_mosaic.version = 11 : i64} {
  func.func @_partial_sum_kernel(%arg0: i32, %arg1: i32, %arg2: memref<2x8x128xf32, #tpu.memory_space<vmem>>, %arg3: memref<1x2x8xf32, #tpu.memory_space<vmem>>) attributes {dimension_semantics = [#tpu.dimension_semantics<parallel>, #tpu.dimension_semantics<arbitrary>], iteration_bounds = array<i64: 2, 2>, scalar_prefetch = 0 : i64, scratch_operands = 0 : i64, tpu.core_type = #tpu.core_type<tc>, window_params = [{transform_indices = @transform_0, window_bounds = array<i64: 2, 8, 128>}, {transform_indices = @transform_1, window_bounds = array<i64: 1, 2, 8>}]} {
    %c0_i32 = arith.constant 0 : i32
    %0 = arith.cmpi eq, %arg1, %c0_i32 : i32
    %1 = arith.extui %0 : i1 to i32
    %c0_i32_0 = arith.constant 0 : i32
    %2 = arith.cmpi ne, %1, %c0_i32_0 : i32
    scf.if %2 {
      %cst_9 = arith.constant 0.000000e+00 : f32
      %9 = vector.broadcast %cst_9 : f32 to vector<1x2x8xf32>
      %c0_10 = arith.constant 0 : index
      %c0_11 = arith.constant 0 : index
      %c0_12 = arith.constant 0 : index
      %10 = vector.load %arg3[%c0_10, %c0_11, %c0_12] : memref<1x2x8xf32, #tpu.memory_space<vmem>>, vector<1x2x8xf32>
      tpu.vector_store %arg3[%c0_10, %c0_11, %c0_12], %9 {strides = array<i32>} : memref<1x2x8xf32, #tpu.memory_space<vmem>>, vector<1x2x8xf32>,
    } else {
    }
    %c0 = arith.constant 0 : index
    %c0_1 = arith.constant 0 : index
    %c0_2 = arith.constant 0 : index
    %3 = vector.load %arg3[%c0, %c0_1, %c0_2] : memref<1x2x8xf32, #tpu.memory_space<vmem>>, vector<1x2x8xf32>
    %c0_3 = arith.constant 0 : index
    %c0_4 = arith.constant 0 : index
    %c0_5 = arith.constant 0 : index
    %4 = vector.load %arg2[%c0_3, %c0_4, %c0_5] : memref<2x8x128xf32, #tpu.memory_space<vmem>>, vector<2x8x128xf32>
    %cst = arith.constant dense<0.000000e+00> : vector<2x8xf32>
    %5 = vector.multi_reduction <add>, %4, %cst [2] : vector<2x8x128xf32> to vector<2x8xf32>
    %6 = vector.shape_cast %5 : vector<2x8xf32> to vector<1x2x8xf32>
    %7 = arith.addf %3, %6 : vector<1x2x8xf32>
    %c0_6 = arith.constant 0 : index
    %c0_7 = arith.constant 0 : index
    %c0_8 = arith.constant 0 : index
    %8 = vector.load %arg3[%c0_6, %c0_7, %c0_8] : memref<1x2x8xf32, #tpu.memory_space<vmem>>, vector<1x2x8xf32>
    tpu.vector_store %arg3[%c0_6, %c0_7, %c0_8], %7 {strides = array<i32>} : memref<1x2x8xf32, #tpu.memory_space<vmem>>, vector<1x2x8xf32>,
    return
  }
  func.func @transform_0(%arg0: i32, %arg1: i32) -> (i32, i32, i32) {
    %c2_i32 = arith.constant 2 : i32
    %0 = arith.muli %arg0, %c2_i32 : i32
    %1 = arith.addi %0, %arg1 : i32
    %c3_i32 = arith.constant 3 : i32
    %2 = arith.minsi %1, %c3_i32 : i32
    %c0_i32 = arith.constant 0 : i32
    %c0_i32_0 = arith.constant 0 : i32
    %c0_i32_1 = arith.constant 0 : i32
    return %c0_i32, %c0_i32_0, %2 : i32, i32, i32
  }
  func.func @transform_1(%arg0: i32, %arg1: i32) -> (i32, i32, i32) {
    %c0_i32 = arith.constant 0 : i32
    %c0_i32_0 = arith.constant 0 : i32
    %c0_i32_1 = arith.constant 0 : i32
    return %arg0, %c0_i32, %c0_i32_0 : i32, i32, i32
  }
}

</mosaic_0001>

<bundles_post_ra>
// kernel: tpu_custom_call.1
= control target key start
LH: loop header
LB: loop body
LE: loop exit
PB: predicated region body
PF: predicated region fallthrough
CT: control target
= control target key end

     0   :  { %6 = vsyncpa [#allocation3], 0  ;;  %s757_s0 = inlined_call_operand.hbm [shape: f32[2,8,512], index: 0, kind: input, shape index: {}]   ;;  %s758_s1 = inlined_call_operand.hbm [shape: f32[2,2,8], index: 1, kind: output, shape index: {}]  }
   0x1   :  { %8 = vsyncpa [#allocation3 + $0x1], 0 }
   0x2   :  { %9 = vsyncpa [#allocation4], 0 }
   0x3   :  { %11 = vsyncpa [#allocation4 + $0x1], 0  ;;  %s577_s6 = smov 0   ;;  %s579_s7 = smov 0  }
   0x4   :  { %s581_s8 = smov 0   ;;  %s583_s9 = smov 0  }
   0x5   :  { %s585_s10 = smov 0   ;;  %s587_s11 = smov 0  }
   0x6   :  { %s589_s12 = smov 0   ;;  %s591_s13 = smov 0  }
   0x7   :  { %s593_s14 = smov 0   ;;  %s595_s15 = smov 0  }
   0x8   :  { %s597_s16 = smov 0  }
   0x9 LB: > { %762 = sst [smem:[#allocation8_spill]] %s557_s15  ;;  %s286_s17 = sadd.s32 4294967295, %s561_s16   ;;  %s561_s16 = sphi %s597_s16, %s17_s16   ;;  %s557_s15 = sphi %s595_s15, %s771_s15   ;;  %s553_s14 = sphi %s593_s14, %s779_s14   ;;  %s549_s13 = sphi %s591_s13, %s769_s13   ;;  %s545_s12 = sphi %s589_s12, %s778_s12   ;;  %s541_s11 = sphi %s587_s11, %s777_s11   ;;  %s537_s10 = sphi %s585_s10, %s776_s10   ;;  %s533_s9 = sphi %s583_s9, %s775_s9   ;;  %s529_s8 = sphi %s581_s8, %s774_s8   ;;  %s525_s7 = sphi %s579_s7, %s773_s7   ;;  %s521_s6 = sphi %s577_s6, %s772_s6  }
   0xa   : > { %s287_s18 = sadd.s32 4294967294, %s561_s16   ;;  %s26_s19 = sadd.s32 1, %s553_s14 }
   0xb   : > { %s29_s20 = sadd.s32 1, %s557_s15  ;;  %p27_p0 = scmp.ge.s32.totalorder %s26_s19, 2 }
   0xc   : > { %s288_s21 = sshll.u32 %s557_s15, 1  ;;  %s44_s23 = sadd.s32 1, %s541_s11 }
   0xd   : > { %s34_s22 = sadd.s32 %s553_s14, %s288_s21  ;;  %s781_s19 = smov (%p27_p0, %s26_s19), 0 }
   0xe   : > { %763 = sst [smem:[#allocation9_spill]] %s781_s19  ;;  %s783_s20 = smov (!%p27_p0, %s29_s20), %s557_s15 }
   0xf   : > { %p35_p1 = scmp.lt.s32.totalorder %s34_s22, 3  ;;  %p51_p2 = scmp.ne.s32.totalorder %s541_s11, %s537_s10 }
  0x10   : > { %p31_p3 = scmp.ge.s32.totalorder %s783_s20, 2  ;;  %p52_p4 = scmp.eq.s32.totalorder %s561_s16, 0 }
  0x11   : > { %s785_s22 = smov (!%p35_p1, %s34_s22), 3  ;;  %p57_p6 = scmp.ne.s32.totalorder %s537_s10, %s533_s9 }
  0x12   : > { %s787_s20 = smov (%p31_p3, %s783_s20), 0  ;;  %p647_p5 = por %p52_p4, %p51_p2 }
  0x13   : > { %764 = sst [smem:[#allocation10_spill]] %s787_s20  ;;  %s289_s25 = sshll.u32 %s787_s20, 1 }
  0x14   : > { %p58_p7 = scmp.eq.s32.totalorder %s286_s17, 0  ;;  %s38_s26 = sadd.s32 %s289_s25, %s781_s19 }
  0x15   : > { %s67_s27 = ssub.s32 %s557_s15, %s787_s20  ;;  %p39_p8 = scmp.lt.s32.totalorder %s38_s26, 3 }
  0x16   : > { %p659_p9 = por %p58_p7, %p57_p6  ;;  %p68_p10 = scmp.eq.s32.totalorder %s67_s27, 0 }
  0x17   : > { %s70_s29 = sadd.s32 1, %s529_s8  ;;  %s789_s26 = smov (!%p39_p8, %s38_s26), 3 }
  0x18   : > { %s665_s30 = scalar_select %p68_p10, %s529_s8, %s70_s29  }
  0x19   : > { %s41_s2 = ssub.s32 %s785_s22, %s789_s26  ;;  %p80_p11 = scmp.ne.s32.totalorder %s529_s8, %s525_s7 }
  0x1a   : > { %p42_p12 = scmp.eq.s32.totalorder %s41_s2, 0  ;;  %p81_p13 = scmp.eq.s32.totalorder %s286_s17, 3 }
  0x1b   : > { %p86_p0 = scmp.ne.s32.totalorder %s525_s7, %s521_s6  ;;  %p87_p1 = scmp.eq.s32.totalorder %s287_s18, 3 }
  0x1c   : > { %s676_s3 = scalar_select %p42_p12, %s541_s11, %s44_s23  }
  0x1d   : > { %p678_p2 = por %p81_p13, %p80_p11  ;;  %p682_p3 = por %p87_p1, %p86_p0 }
  0x1e   : > { %p315_p4 = scmp.lt.s32.totalorder %s561_s16, 4  ;;  %s107_s9 = sand.u32 1, %s541_s11  }
  0x1f   : > { %s294_s21 = sshll.u32 %s785_s22, 3  ;;  %s292_s17 = sshll.u32 %s107_s9, 4 }
  0x20   : > { %s119_s27 = scalar_lea.hbm %s757_s0, %s294_s21  ;;  %s111_s23 = scalar_lea.vmem [#allocation2], %s292_s17 }
  0x21   : > { %s120_s18 = sshll.u32 %s119_s27, 4  ;;  %s122_s29 = sshll.u32 %s111_s23, 4  ;;  %s121_s18 = int_to_ptr.hbm [resolvable:$true] %s120_s18  ;;  %s123_s29 = int_to_ptr.vmem [resolvable:$true] %s122_s29 }
  0x22   : > { %p308_p6 = pnand %p315_p4, %p647_p5  ;;  %p295_p7 = scmp.ge.s32.totalorder %s561_s16, 1 }
  0x23   : > { %s108_s2 = scalar_lea.sflag [#allocation3], %s107_s9  ;;  %s563_s20 = smov 512  }
  0x24   : > { %s564_s19 = smov 128   ;;  %s565_s15 = smov 8  }
  0x25   : > { %310 = dma.hbm_to_vmem [thread:$0]  (!%p308_p6), %s121_s18, 256, %s123_s29, %s108_s2, %s563_s20, %s564_s19, %s565_s15  }
  0x26   : > { %p130_p8 = scmp.lt.s32.totalorder %s561_s16, 5 }
  0x28   : > { %p131_p10 = pnand %p295_p7, %p130_p8 }
  0x29   : > { %s136_s22 = sand.u32 (!%p131_p10), 1, %s537_s10  }
  0x2a   : > { %134 = sbr.rel (%p131_p10) target bundleno = 190 (0xbe), region = 24  ;;  %s296_s21 = sshll.u32 (!%p131_p10), %s136_s22, 4 }
  0x2b   : > { %s137_s25 = scalar_lea.sflag (!%p131_p10), [#allocation3], %s136_s22  ;;  %s140_s17 = scalar_lea.vmem (!%p131_p10), [#allocation2], %s296_s21 }
  0x2f   : > { %512 = dma.done.wait (%p659_p9), %s137_s25, 256  }
  0x30   : > { %514 = vsyncadd (%p659_p9), %s137_s25, 4294967040  ;;  %s157_s24 = sand.u32 1, %s525_s7   ;;  %p298_p5 = scmp.ne.s32.totalorder %s545_s12, 0 }
  0x31   : > { %s297_s9 = sshll.u32 %s157_s24, 1 }
  0x32   : > { %s159_s15 = scalar_lea.vmem [#allocation5], %s297_s9  ;;  %167 = sbr.rel (%p298_p5) target bundleno = 57 (0x39), region = 32 }
  0x37   : > { %vm168_vm0 = vcmask 58368   ;;  %v566_v0 = vmov 0.0  }
  0x38   : > { %169 = vst.msk [vmem:[%s159_s15] sm:$0x3] %vm168_vm0, %v566_v0 }
  0x39 PF: > { %v171_v1 = vld [vmem:[%s140_s17] sm:$0xff]  ;;  %v172_v2 = vld [vmem:[%s140_s17 + $0x8] sm:$0xff]  ;;  %v179_v4 = vlaneseq  ;;  %s300_s19 = sshll.u32 %s549_s13, 1  ;;  %vm183_vm1 = vcmask 1041409   ;;  %s202_s12 = sshll.u32 %s159_s15, 4  ;;  %vm187_vm2 = vcmask 58368   ;;  %s203_s12 = int_to_ptr.vmem [resolvable:$true] %s202_s12 }
  0x3a   : > { %173 = vadd.xlane.f32.xlu0 %v171_v1  ;;  %s200_s26 = scalar_lea.hbm %s758_s1, %s300_s19  ;;  %s190_s13 = scalar_lea.sflag [#allocation4], %s157_s24 }
  0x3b   : > { %v180_v5 = vand.u32 127, %v179_v4  ;;  %s204_s27 = sshll.u32 %s200_s26, 4  ;;  %s459_s22 = scalar_lea.hbm %s758_s1, 4  ;;  %s205_s27 = int_to_ptr.hbm [resolvable:$true] %s204_s27 }
  0x3c   : > { %s453_s18 = sshra.s32 %s205_s27, 4  ;;  %s454_s18 = int_to_ptr.hbm [resolvable:$true] %s453_s18 }
  0x3d   : > { %s455_s23 = scalar_lea.hbm %s454_s18, 2  ;;  %p460_p13 = scmp.lt.s32.totalorder %s454_s18, %s758_s1 }
  0x3e   : > { %p456_p9 = scmp.ne.s32.totalorder %s454_s18, %s455_s23  ;;  %p461_p0 = scmp.lt.s32.totalorder %s459_s22, %s455_s23 }
  0x3f   : > { %v170_v9 = vld [vmem:[%s159_s15] sm:$0x3] }
  0x40   : > { %p457_p11 = pnand %p456_p9, %p678_p2  ;;  %p462_p1 = por %p461_p0, %p460_p13 }
  0x42   : > { %175 = vadd.xlane.f32.xlu0 %v172_v2  ;;  %p458_p12 = pneg %p457_p11 }
  0x44   : > { %p463_p4 = pnand %p462_p1, %p458_p12 }
  0xad   : > { %v174_v3 = vpop.xlane.xlu0 %173 }
  0xae   : > { %v181_v7 = vperm.slane %v174_v3, %v180_v5 }
  0xb5   : > { %v176_v6 = vpop.xlane.xlu0 %175 }
  0xb6   : > { %v182_v8 = vperm.slane %v176_v6, %v180_v5 }
  0xb8   : > { %v184_v10 = vsel %vm183_vm1, %v182_v8, %v181_v7 }
  0xb9   : > { %v186_v11 = vadd.f32 %v184_v10, %v170_v9 }
  0xbb   : > { %188 = vst.msk [vmem:[%s159_s15] sm:$0x3] %vm187_vm2, %v186_v11 }
  0xbc   : > { %466 = shalt.err (!%p463_p4)
}
  0xbd   : > { %305 = dma.vmem_to_hbm [thread:$0]  (%p678_p2), %s203_s12, 32, %s205_s27, %s190_s13  }
  0xbe PF: > { %p316_p6 = scmp.ge.s32.totalorder %s561_s16, 2  ;;  %s216_s17 = sand.u32 1, %s521_s6  }
  0xbf   : > { %s217_s24 = scalar_lea.sflag [#allocation4], %s216_s17 }
  0xc0   : > { %p312_p7 = pnand %p316_p6, %p682_p3 }
  0xc2   : > { %p313_p8 = pneg %p312_p7 }
  0xc4   : > { %516 = dma.done.wait (%p313_p8), %s217_s24, 32  }
  0xc5   : > { %518 = vsyncadd (%p313_p8), %s217_s24, 4294967264  ;;  %s17_s16 = sadd.s32 1, %s561_s16   ;;  %s769_s13 = sld [smem:[#allocation8_spill]] }
  0xc6   : > { %p14_p10 = scmp.ge.s32.totalorder %s17_s16, 6   ;;  %s770_s4 = sld [smem:[#allocation9_spill]] }
  0xc7   : > { %s771_s15 = sld [smem:[#allocation10_spill]]  ;;  %s772_s6 = smov %s525_s7 }
  0xc8   : > { %s773_s7 = smov %s529_s8  ;;  %s774_s8 = smov %s665_s30 }
  0xc9   : > { %s775_s9 = smov %s537_s10  ;;  %s776_s10 = smov %s541_s11 }
  0xca   : > { %s777_s11 = smov %s676_s3  ;;  %s778_s12 = smov %s553_s14 }
  0xcb   :  { %16 = sbr.rel (!%p14_p10) target bundleno = 9 (0x9), region = 73 }
  0xcc   : > { %s779_s14 = smov %s770_s4 }
  0xd0   :  { %223 = vsyncpa [#allocation3], 1 }
  0xd1   :  { %225 = vsyncpa [#allocation3 + $0x1], 1 }
  0xd2   :  { %226 = vsyncpa [#allocation4], 1 }
  0xd3   :  { %228 = vsyncpa [#allocation4 + $0x1], 1 }

</bundles_post_ra>
